<compile_context>
chip_gen: v6e
topology: v6e:2x2x1
jax: 0.10.0
libtpu: 0.0.40
codegen_flags: <defaults>
</compile_context>

<pallas_src>
import functools

import jax
import jax.numpy as jnp
import numpy as np
from jax.experimental import pallas as pl
from jax.experimental.pallas import tpu as pltpu

KEHALF = 7.199822675975274  # kehalf_ase; unit conversion factors == 1 for defaults


def _tpu_vmem_capacity_bytes() -> int:
    """Physical VMEM of the local TPU; conservative 64 MiB (v7x) fallback."""
    try:
        info = pltpu.get_tpu_info()
        cap = getattr(info, "vmem_capacity_bytes", None)
        if cap:
            return int(cap)
    except Exception:
        pass
    return 64 * 1024 * 1024


def _tensorcores_per_device() -> int:
    """2 on dual-TensorCore parts (v7x); 1 on v5e/v6e (and on any failure)."""
    try:
        kind = jax.devices()[0].device_kind.lower()
    except Exception:
        return 1
    return 2 if "7" in kind else 1


def _pc_kernel(d_ref, eqq_ref, ii_ref, o_ref, *,
               cutoff: float, cutoff_sr: float, chunk: int):
    """One (slice, atom-block, pair-tile) step of the damped point-charge sum.

    d_ref  : (1, TP)  f32   pair distances (pairs on lanes)
    eqq_ref: (1, TP)  f32   kehalf * q[idx_i] * q[idx_j] (0 on padded pairs)
    ii_ref : (1, TP)  i32   first-atom index of each pair (lane-dense)
    o_ref  : (1, TA)  f32   lane-dense per-atom energy accumulator for this
                            atom block (resident across the pair-tile axis)
    """
    ta = o_ref.shape[1]
    tile_p = d_ref.shape[1]
    n_chunks = tile_p // chunk

    # Zero this (slice, atom-block) accumulator on its first pair tile.
    @pl.when(pl.program_id(2) == 0)
    def _():
        o_ref[...] = jnp.zeros_like(o_ref)

    # Global atom ids covered by this atom block, along sublanes: (TA, 1).
    base = pl.program_id(1) * ta
    atom_col = base + jax.lax.broadcasted_iota(jnp.int32, (ta, 1), 0)

    inv_csr = 1.0 / cutoff_sr
    inv_cut2 = 1.0 / (cutoff * cutoff)
    two_over_cut = 2.0 / cutoff

    acc = jnp.zeros((3, ta), jnp.float32)
    # Static chunk loop: independent mask-build / matmul chains per chunk let
    # the scheduler overlap VALU work of chunk j+1 with MXU pushes of chunk j,
    # and keep the (TA, chunk) intermediates small.
    for c in range(n_chunks):
        sl = pl.ds(c * chunk, chunk)
        d = d_ref[:, sl]       # (1, C) f32
        eqq = eqq_ref[:, sl]   # (1, C) f32
        ii = ii_ref[:, sl]     # (1, C) i32

        # Damped / ordinary Coulomb with Poly6 switching + shifted-force trunc.
        inv_d = 1.0 / d
        inv_dd = jax.lax.rsqrt(d * d + 1.0)
        x = d * inv_csr
        x2 = x * x
        x3 = x2 * x
        sw = jnp.where(d < cutoff_sr,
                       1.0 - 6.0 * x3 * x2 + 15.0 * x2 * x2 - 10.0 * x3,
                       0.0)
        e = eqq * (sw * inv_dd + (1.0 - sw) * inv_d
                   + (d * inv_cut2 - two_over_cut))
        e = jnp.where(d <= cutoff, e, 0.0)                       # (1, C) f32

        # Exact f32 -> 3x bf16 split: the single-pass bf16 matmul then
        # reproduces f32 accuracy (0/1 mask exact in bf16, bf16*bf16 products
        # exact in f32, MXU accumulates in f32).
        e0 = e.astype(jnp.bfloat16)
        r1 = e - e0.astype(jnp.float32)
        e1 = r1.astype(jnp.bfloat16)
        r2 = r1 - e1.astype(jnp.float32)
        e2 = r2.astype(jnp.bfloat16)
        e_stack = jnp.concatenate([e0, e1, e2], axis=0)          # (3, C) bf16

        # Transposed one-hot scatter mask: atoms on sublanes, pairs on lanes.
        mask_t = (atom_col == ii).astype(jnp.bfloat16)           # (TA, C) bf16

        # (3, C) . (TA, C)^T -> (3, TA): one bf16 MXU pass, f32 accumulation.
        acc = acc + jax.lax.dot_general(
            e_stack, mask_t,
            dimension_numbers=(((1,), (1,)), ((), ())),
            preferred_element_type=jnp.float32)

    o_ref[...] += acc[0:1, :] + acc[1:2, :] + acc[2:3, :]


def pc_damped_electrostatics(atomic_charges, distances, idx_i, idx_j, *,
                             cutoff: float, cutoff_short_range: float):
    """Pallas wrapper reproducing PC_damped_electrostatics.forward."""
    if cutoff_short_range is None or cutoff_short_range == cutoff:
        cutoff_short_range = cutoff

    n_atoms = atomic_charges.shape[0]
    n_pairs = distances.shape[0]

    # --- per-generation sizing ---------------------------------------------
    vmem_cap = _tpu_vmem_capacity_bytes()
    if vmem_cap >= 96 * 1024 * 1024:       # v5e / v6e: 128 MiB physical VMEM
        vmem_limit = 96 * 1024 * 1024
        ta_cap = 2048                      # atom-block lanes
        tile_target = 8192                 # pairs per grid step
    else:                                  # v7x: 64 MiB physical VMEM
        vmem_limit = 40 * 1024 * 1024
        ta_cap = 1024
        tile_target = 4096
    chunk_target = 512                     # pairs per in-kernel sub-chunk

    # --- atom-axis tiling (bounds VMEM for any atom count) ------------------
    n_pad = max(128, pl.cdiv(n_atoms, 128) * 128)
    n_atom_blocks = pl.cdiv(n_pad, ta_cap)
    ta = pl.cdiv(pl.cdiv(n_pad, n_atom_blocks), 128) * 128
    n_pad = ta * n_atom_blocks

    # --- pair tiling ---------------------------------------------------------
    tile_p = min(tile_target, max(128, pl.cdiv(n_pairs, 128) * 128))
    chunk = min(chunk_target, tile_p)
    tile_p = pl.cdiv(tile_p, chunk) * chunk

    # Two slices across the two v7x TensorCores only when both get real work;
    # single-TensorCore v5e/v6e keep a single accumulator (no wasted writeback).
    cores = _tensorcores_per_device()
    num_slices = 2 if (cores >= 2 and pl.cdiv(n_pairs, tile_p) >= 2) else 1
    tiles_per_slice = max(1, pl.cdiv(n_pairs, num_slices * tile_p))
    p_pad = num_slices * tiles_per_slice * tile_p
    pad = p_pad - n_pairs

    # Charge gather + kehalf prefactor via XLA's native gather (cheap), so the
    # kernel only builds the scatter mask.
    q = atomic_charges.astype(jnp.float32)
    eqq = KEHALF * q[idx_i] * q[idx_j]
    eqq = jnp.pad(eqq, (0, pad)).reshape(1, p_pad)

    # Padded pairs: d > cutoff (-> exactly zero energy), idx 0 (-> harmless).
    d = jnp.pad(distances.astype(jnp.float32), (0, pad),
                constant_values=2.0 * cutoff + 1.0).reshape(1, p_pad)
    ii = jnp.pad(idx_i.astype(jnp.int32), (0, pad)).reshape(1, p_pad)

    kernel = functools.partial(_pc_kernel, cutoff=float(cutoff),
                               cutoff_sr=float(cutoff_short_range),
                               chunk=chunk)

    out = pl.pallas_call(
        kernel,
        out_shape=jax.ShapeDtypeStruct((num_slices, 1, n_pad), jnp.float32),
        grid=(num_slices, n_atom_blocks, tiles_per_slice),
        in_specs=[
            pl.BlockSpec((1, tile_p),
                         lambda c, a, k: (0, c * tiles_per_slice + k)),  # d
            pl.BlockSpec((1, tile_p),
                         lambda c, a, k: (0, c * tiles_per_slice + k)),  # eqq
            pl.BlockSpec((1, tile_p),
                         lambda c, a, k: (0, c * tiles_per_slice + k)),  # idx_i
        ],
        out_specs=pl.BlockSpec((None, 1, ta),
                               lambda c, a, k: (c, 0, a)),               # accum
        compiler_params=pltpu.CompilerParams(
            dimension_semantics=("parallel", "parallel", "arbitrary"),
            vmem_limit_bytes=vmem_limit),
    )(d, eqq, ii)

    # Combine per-core partial accumulators and strip lane padding.
    return jnp.sum(out[:, 0, :n_atoms], axis=0)


def _reference(atomic_charges, distances, idx_i, idx_j, *,
               cutoff, cutoff_short_range):
    """Pure-JAX reference of the PyTorch forward (truncation='force')."""
    q = atomic_charges.astype(jnp.float32)
    d = distances.astype(jnp.float32)
    qi = q[idx_i]
    qj = q[idx_j]
    dd = jnp.sqrt(d * d + 1.0)
    x = d / cutoff_short_range
    sw = jnp.where(d < cutoff_short_range,
                   1.0 - 6.0 * x**5 + 15.0 * x**4 - 10.0 * x**3, 0.0)
    so = 1.0 - sw
    e = KEHALF * qi * qj * (sw / dd + so / d + d / cutoff**2 - 2.0 / cutoff)
    e = jnp.where(d <= cutoff, e, 0.0)
    return jnp.zeros_like(q).at[idx_i].add(e)


if __name__ == "__main__":
    key = jax.random.PRNGKey(0)
    k_pos, k_chg = jax.random.split(key)

    # Small synthetic system: N atoms, all ordered pairs i != j.
    n_atoms = 16
    cutoff = 4.0
    cutoff_short_range = 2.0

    positions = jax.random.uniform(k_pos, (n_atoms, 3), dtype=jnp.float32,
                                   minval=0.0, maxval=4.0)
    atomic_charges = 0.5 * jax.random.normal(k_chg, (n_atoms,),
                                             dtype=jnp.float32)

    ai, aj = jnp.meshgrid(jnp.arange(n_atoms), jnp.arange(n_atoms),
                          indexing="ij")
    off_diag = ~jnp.eye(n_atoms, dtype=bool)
    idx_i = ai[off_diag].astype(jnp.int32)            # (240,)
    idx_j = aj[off_diag].astype(jnp.int32)            # (240,)
    distances = jnp.linalg.norm(positions[idx_i] - positions[idx_j], axis=-1)

    out = pc_damped_electrostatics(
        atomic_charges, distances, idx_i, idx_j,
        cutoff=cutoff, cutoff_short_range=cutoff_short_range)
    out = jax.block_until_ready(out)

    ref = _reference(atomic_charges, distances, idx_i, idx_j,
                     cutoff=cutoff, cutoff_short_range=cutoff_short_range)
    ref = jax.block_until_ready(ref)

    np.testing.assert_allclose(np.asarray(out), np.asarray(ref),
                               rtol=1e-5, atol=1e-5)
    print("KERNEL_OK")
</pallas_src>

<mosaic_0001>
module attributes {stable_mosaic.version = 11 : i64} {
  func.func @_pc_kernel(%arg0: i32, %arg1: i32, %arg2: i32, %arg3: memref<1x256xf32, #tpu.memory_space<vmem>>, %arg4: memref<1x256xf32, #tpu.memory_space<vmem>>, %arg5: memref<1x256xi32, #tpu.memory_space<vmem>>, %arg6: memref<1x1x128xf32, #tpu.memory_space<vmem>>) attributes {dimension_semantics = [#tpu.dimension_semantics<parallel>, #tpu.dimension_semantics<parallel>, #tpu.dimension_semantics<arbitrary>], iteration_bounds = array<i64: 1, 1, 1>, scalar_prefetch = 0 : i64, scratch_operands = 0 : i64, tpu.core_type = #tpu.core_type<tc>, window_params = [{transform_indices = @transform_0, window_bounds = array<i64: 1, 256>}, {transform_indices = @transform_1, window_bounds = array<i64: 1, 256>}, {transform_indices = @transform_2, window_bounds = array<i64: 1, 256>}, {transform_indices = @transform_3, window_bounds = array<i64: 1, 1, 128>}]} {
    %c0_i32 = arith.constant 0 : i32
    %0 = arith.cmpi eq, %arg2, %c0_i32 : i32
    %1 = arith.extui %0 : i1 to i32
    %c0_i32_0 = arith.constant 0 : i32
    %2 = arith.cmpi ne, %1, %c0_i32_0 : i32
    scf.if %2 {
      %cst_27 = arith.constant 0.000000e+00 : f32
      %79 = vector.broadcast %cst_27 : f32 to vector<1x128xf32>
      %c0_28 = arith.constant 0 : index
      %c0_29 = arith.constant 0 : index
      %c0_30 = arith.constant 0 : index
      %80 = vector.load %arg6[%c0_28, %c0_29, %c0_30] : memref<1x1x128xf32, #tpu.memory_space<vmem>>, vector<1x1x128xf32>
      %81 = vector.shape_cast %80 : vector<1x1x128xf32> to vector<1x128xf32>
      %82 = vector.shape_cast %79 : vector<1x128xf32> to vector<1x1x128xf32>
      tpu.vector_store %arg6[%c0_28, %c0_29, %c0_30], %82 {strides = array<i32>} : memref<1x1x128xf32, #tpu.memory_space<vmem>>, vector<1x1x128xf32>,
    } else {
    }
    %c128_i32 = arith.constant 128 : i32
    %3 = arith.muli %arg1, %c128_i32 : i32
    %4 = tpu.iota {dimensions = array<i32: 0>} : vector<128x1xi32>
    %5 = vector.broadcast %3 : i32 to vector<128x1xi32>
    %6 = arith.addi %5, %4 : vector<128x1xi32>
    %cst = arith.constant 0.000000e+00 : f32
    %7 = vector.broadcast %cst : f32 to vector<3x128xf32>
    %c0 = arith.constant 0 : index
    %c0_1 = arith.constant 0 : index
    %8 = vector.load %arg3[%c0, %c0_1] : memref<1x256xf32, #tpu.memory_space<vmem>>, vector<1x256xf32>
    %c0_2 = arith.constant 0 : index
    %c0_3 = arith.constant 0 : index
    %9 = vector.load %arg4[%c0_2, %c0_3] : memref<1x256xf32, #tpu.memory_space<vmem>>, vector<1x256xf32>
    %c0_4 = arith.constant 0 : index
    %c0_5 = arith.constant 0 : index
    %10 = vector.load %arg5[%c0_4, %c0_5] : memref<1x256xi32, #tpu.memory_space<vmem>>, vector<1x256xi32>
    %cst_6 = arith.constant 1.000000e+00 : f32
    %11 = vector.broadcast %cst_6 : f32 to vector<1x256xf32>
    %12 = arith.divf %11, %8 : vector<1x256xf32>
    %13 = arith.mulf %8, %8 : vector<1x256xf32>
    %cst_7 = arith.constant 1.000000e+00 : f32
    %14 = vector.broadcast %cst_7 : f32 to vector<1x256xf32>
    %15 = arith.addf %13, %14 : vector<1x256xf32>
    %16 = math.rsqrt %15 : vector<1x256xf32>
    %cst_8 = arith.constant 5.000000e-01 : f32
    %17 = vector.broadcast %cst_8 : f32 to vector<1x256xf32>
    %18 = arith.mulf %8, %17 : vector<1x256xf32>
    %19 = arith.mulf %18, %18 : vector<1x256xf32>
    %20 = arith.mulf %19, %18 : vector<1x256xf32>
    %cst_9 = arith.constant 2.000000e+00 : f32
    %21 = vector.broadcast %cst_9 : f32 to vector<1x256xf32>
    %22 = arith.cmpf olt, %8, %21 : vector<1x256xf32>
    %cst_10 = arith.constant 6.000000e+00 : f32
    %23 = vector.broadcast %cst_10 : f32 to vector<1x256xf32>
    %24 = arith.mulf %23, %20 : vector<1x256xf32>
    %25 = arith.mulf %24, %19 : vector<1x256xf32>
    %cst_11 = arith.constant 1.000000e+00 : f32
    %26 = vector.broadcast %cst_11 : f32 to vector<1x256xf32>
    %27 = arith.subf %26, %25 : vector<1x256xf32>
    %cst_12 = arith.constant 1.500000e+01 : f32
    %28 = vector.broadcast %cst_12 : f32 to vector<1x256xf32>
    %29 = arith.mulf %28, %19 : vector<1x256xf32>
    %30 = arith.mulf %29, %19 : vector<1x256xf32>
    %31 = arith.addf %27, %30 : vector<1x256xf32>
    %cst_13 = arith.constant 1.000000e+01 : f32
    %32 = vector.broadcast %cst_13 : f32 to vector<1x256xf32>
    %33 = arith.mulf %32, %20 : vector<1x256xf32>
    %34 = arith.subf %31, %33 : vector<1x256xf32>
    %cst_14 = arith.constant 0.000000e+00 : f32
    %35 = vector.broadcast %cst_14 : f32 to vector<1x256xf32>
    %36 = arith.select %22, %34, %35 : vector<1x256xi1>, vector<1x256xf32>
    %37 = arith.mulf %36, %16 : vector<1x256xf32>
    %cst_15 = arith.constant 1.000000e+00 : f32
    %38 = vector.broadcast %cst_15 : f32 to vector<1x256xf32>
    %39 = arith.subf %38, %36 : vector<1x256xf32>
    %40 = arith.mulf %39, %12 : vector<1x256xf32>
    %41 = arith.addf %37, %40 : vector<1x256xf32>
    %cst_16 = arith.constant 6.250000e-02 : f32
    %42 = vector.broadcast %cst_16 : f32 to vector<1x256xf32>
    %43 = arith.mulf %8, %42 : vector<1x256xf32>
    %cst_17 = arith.constant 5.000000e-01 : f32
    %44 = vector.broadcast %cst_17 : f32 to vector<1x256xf32>
    %45 = arith.subf %43, %44 : vector<1x256xf32>
    %46 = arith.addf %41, %45 : vector<1x256xf32>
    %47 = arith.mulf %9, %46 : vector<1x256xf32>
    %cst_18 = arith.constant 4.000000e+00 : f32
    %48 = vector.broadcast %cst_18 : f32 to vector<1x256xf32>
    %49 = arith.cmpf ole, %8, %48 : vector<1x256xf32>
    %cst_19 = arith.constant 0.000000e+00 : f32
    %50 = vector.broadcast %cst_19 : f32 to vector<1x256xf32>
    %51 = arith.select %49, %47, %50 : vector<1x256xi1>, vector<1x256xf32>
    %52 = arith.truncf %51 : vector<1x256xf32> to vector<1x256xbf16>
    %53 = arith.extf %52 : vector<1x256xbf16> to vector<1x256xf32>
    %54 = arith.subf %51, %53 : vector<1x256xf32>
    %55 = arith.truncf %54 : vector<1x256xf32> to vector<1x256xbf16>
    %56 = arith.extf %55 : vector<1x256xbf16> to vector<1x256xf32>
    %57 = arith.subf %54, %56 : vector<1x256xf32>
    %58 = arith.truncf %57 : vector<1x256xf32> to vector<1x256xbf16>
    %59 = tpu.concatenate %52, %55, %58 in 0 : vector<1x256xbf16>, vector<1x256xbf16>, vector<1x256xbf16> -> vector<3x256xbf16>
    %60 = vector.broadcast %6 : vector<128x1xi32> to vector<128x256xi32>
    %61 = vector.broadcast %10 : vector<1x256xi32> to vector<128x256xi32>
    %62 = arith.cmpi eq, %60, %61 : vector<128x256xi32>
    %63 = arith.extui %62 : vector<128x256xi1> to vector<128x256xi32>
    %64 = arith.sitofp %63 : vector<128x256xi32> to vector<128x256xf32>
    %65 = arith.truncf %64 : vector<128x256xf32> to vector<128x256xbf16>
    %cst_20 = arith.constant dense<0.000000e+00> : vector<3x128xf32>
    %66 = tpu.matmul %59, %65, %cst_20 {dimension_numbers = #tpu.dot_dimension_numbers<[1], [1], [0], [0], [0, 0, 1, 0], [], []>} : vector<3x256xbf16>, vector<128x256xbf16>, vector<3x128xf32> -> vector<3x128xf32>
    %67 = arith.addf %7, %66 : vector<3x128xf32>
    %c0_21 = arith.constant 0 : index
    %c0_22 = arith.constant 0 : index
    %c0_23 = arith.constant 0 : index
    %68 = vector.load %arg6[%c0_21, %c0_22, %c0_23] : memref<1x1x128xf32, #tpu.memory_space<vmem>>, vector<1x1x128xf32>
    %69 = vector.shape_cast %68 : vector<1x1x128xf32> to vector<1x128xf32>
    %70 = vector.extract_strided_slice %67 {offsets = [0, 0], sizes = [1, 128], strides = [1, 1]} : vector<3x128xf32> to vector<1x128xf32>
    %71 = vector.extract_strided_slice %67 {offsets = [1, 0], sizes = [1, 128], strides = [1, 1]} : vector<3x128xf32> to vector<1x128xf32>
    %72 = arith.addf %70, %71 : vector<1x128xf32>
    %73 = vector.extract_strided_slice %67 {offsets = [2, 0], sizes = [1, 128], strides = [1, 1]} : vector<3x128xf32> to vector<1x128xf32>
    %74 = arith.addf %72, %73 : vector<1x128xf32>
    %75 = arith.addf %69, %74 : vector<1x128xf32>
    %c0_24 = arith.constant 0 : index
    %c0_25 = arith.constant 0 : index
    %c0_26 = arith.constant 0 : index
    %76 = vector.load %arg6[%c0_24, %c0_25, %c0_26] : memref<1x1x128xf32, #tpu.memory_space<vmem>>, vector<1x1x128xf32>
    %77 = vector.shape_cast %76 : vector<1x1x128xf32> to vector<1x128xf32>
    %78 = vector.shape_cast %75 : vector<1x128xf32> to vector<1x1x128xf32>
    tpu.vector_store %arg6[%c0_24, %c0_25, %c0_26], %78 {strides = array<i32>} : memref<1x1x128xf32, #tpu.memory_space<vmem>>, vector<1x1x128xf32>,
    return
  }
  func.func @transform_0(%arg0: i32, %arg1: i32, %arg2: i32) -> (i32, i32) {
    %c1_i32 = arith.constant 1 : i32
    %0 = arith.muli %arg0, %c1_i32 : i32
    %1 = arith.addi %0, %arg2 : i32
    %c0_i32 = arith.constant 0 : i32
    %c0_i32_0 = arith.constant 0 : i32
    return %c0_i32, %1 : i32, i32
  }
  func.func @transform_1(%arg0: i32, %arg1: i32, %arg2: i32) -> (i32, i32) {
    %c1_i32 = arith.constant 1 : i32
    %0 = arith.muli %arg0, %c1_i32 : i32
    %1 = arith.addi %0, %arg2 : i32
    %c0_i32 = arith.constant 0 : i32
    %c0_i32_0 = arith.constant 0 : i32
    return %c0_i32, %1 : i32, i32
  }
  func.func @transform_2(%arg0: i32, %arg1: i32, %arg2: i32) -> (i32, i32) {
    %c1_i32 = arith.constant 1 : i32
    %0 = arith.muli %arg0, %c1_i32 : i32
    %1 = arith.addi %0, %arg2 : i32
    %c0_i32 = arith.constant 0 : i32
    %c0_i32_0 = arith.constant 0 : i32
    return %c0_i32, %1 : i32, i32
  }
  func.func @transform_3(%arg0: i32, %arg1: i32, %arg2: i32) -> (i32, i32, i32) {
    %c0_i32 = arith.constant 0 : i32
    %c0_i32_0 = arith.constant 0 : i32
    return %arg0, %c0_i32, %arg1 : i32, i32, i32
  }
}

</mosaic_0001>

<bundles_post_ra>
// kernel: tpu_custom_call.1
= control target key start
LH: loop header
LB: loop body
LE: loop exit
PB: predicated region body
PF: predicated region fallthrough
CT: control target
= control target key end

     0   :  { %8 = vsyncpa [#allocation3], 0  ;;  %s712_s0 = inlined_call_operand.hbm [shape: f32[1,256], index: 0, kind: input, shape index: {}]   ;;  %s713_s1 = inlined_call_operand.hbm [shape: f32[1,256], index: 1, kind: input, shape index: {}]   ;;  %s714_s2 = inlined_call_operand.vmem [shape: s32[1,256], index: 2, kind: input, shape index: {}]   ;;  %s715_s3 = inlined_call_operand.hbm [shape: f32[1,1,128], index: 3, kind: output, shape index: {}]  }
   0x1   :  { %9 = vsyncpa [#allocation6], 0 }
   0x2   :  { %10 = vsyncpa [#allocation4], 0  ;;  %s579_s12 = smov [#allocation2]   ;;  %s580_s14 = smov [#allocation5]  }
   0x3   :  { %s21_s13 = sshll.u32 %s579_s12, 4  ;;  %s35_s15 = sshll.u32 %s580_s14, 4  ;;  %s22_s13 = int_to_ptr.vmem [resolvable:$true] %s21_s13  ;;  %s36_s15 = int_to_ptr.vmem [resolvable:$true] %s35_s15 }
   0x4   :  { %s521_s16 = scalar_lea.vmem %s22_s13, 32  ;;  %p526_p1 = scmp.lt.s32.totalorder %s22_s13, %s22_s13 }
   0x5   :  { %p522_p0 = scmp.ne.s32.totalorder %s22_s13, %s521_s16  ;;  %p527_p2 = scmp.lt.s32.totalorder %s521_s16, %s521_s16 }
   0x7   :  { %p528_p3 = por %p527_p2, %p526_p1 }
   0x9   :  { %p529_p4 = pnand %p528_p3, %p522_p0 }
   0xb   :  { %532 = shalt.err (!%p529_p4)
}
   0xc   :  { %24 = dma.hbm_to_vmem [thread:$0]  %s712_s0, 32, %s22_s13, [#allocation3]  }
   0xd   :  { %s541_s19 = scalar_lea.vmem %s36_s15, 32  ;;  %p546_p6 = scmp.lt.s32.totalorder %s36_s15, %s36_s15 }
   0xe   :  { %p542_p5 = scmp.ne.s32.totalorder %s36_s15, %s541_s19  ;;  %p547_p7 = scmp.lt.s32.totalorder %s541_s19, %s541_s19 }
  0x10   :  { %p548_p8 = por %p547_p7, %p546_p6 }
  0x12   :  { %p549_p9 = pnand %p548_p8, %p542_p5 }
  0x14   :  { %552 = shalt.err (!%p549_p9)
}
  0x15   :  { %38 = dma.hbm_to_vmem [thread:$0]  %s713_s1, 32, %s36_s15, [#allocation6]  }
  0x16   :  { %573 = dma.done.wait [#allocation3], 32  }
  0x17   :  { %574 = vsyncadd [#allocation3], 4294967264 }
  0x18   :  { %575 = dma.done.wait [#allocation6], 32  }
  0x19   :  { %576 = vsyncadd [#allocation6], 4294967264  ;;  %v77_v0 = vlaneseq  ;;  %v113_v6 = vld [vmem:[%s714_s2] sm:$0x3]  ;;  %v581_v12 = vmov 1.0|1.0  }
  0x1a   :  { %v638_v11 = vld [vmem:[#allocation2] sm:$0x3]  ;;  %v112_v43 = vld [vmem:[#allocation5] sm:$0x3]  ;;  %v582_v45 = vmov 1966171168  }
  0x1b   :  { %v611_v1 = vshrl.u32 %v77_v0, 7  ;;  %v116_v15 = vmul.f32 %v638_v11, %v638_v11  ;;  %v119_v16 = vmul.f32 0.5, %v638_v11  ;;  %509 = vrcp.f32 %v638_v11  ;;  %s584_s1 = smov [#allocation7]  }
  0x1c   :  { %v136_v32 = vmul.f32 0.0625, %v638_v11  ;;  %v161_v46 = vunpack.c.l.s4 %v582_v45  ;;  %s425_s2 = sshll.u32 %s584_s1, 4  ;;  %s426_s2 = int_to_ptr.vmem [resolvable:$true] %s425_s2 }
  0x1d   :  { %v614_v2 = vsub.s32 0, %v611_v1  ;;  %v617_v3 = vsub.s32 1, %v611_v1  ;;  %v92_v4 = vadd.s32 112, %v611_v1  ;;  %v93_v5 = vadd.s32 120, %v611_v1  ;;  %s553_s23 = scalar_lea.vmem %s426_s2, 16  ;;  %s557_s24 = scalar_lea.vmem %s426_s2, 32 }
  0x1e   :  { %v90_v7 = vadd.s32 96, %v611_v1  ;;  %v91_v8 = vadd.s32 104, %v611_v1  ;;  %v88_v13 = vadd.s32 80, %v611_v1  ;;  %v89_v14 = vadd.s32 88, %v611_v1  ;;  %p554_p10 = scmp.ne.s32.totalorder %s426_s2, %s553_s23  ;;  %p558_p11 = scmp.lt.s32.totalorder %s426_s2, %s426_s2 }
  0x1f   :  { %v627_v9 = vrot.slane %v113_v6, %v614_v2  ;;  %v630_v10 = vrot.slane %v113_v6, %v617_v3  ;;  %v117_v17 = vadd.f32 1.0, %v116_v15  ;;  %v120_v18 = vmul.f32 %v119_v16, %v119_v16  ;;  %p559_p12 = scmp.lt.s32.totalorder %s557_s24, %s553_s23 }
  0x20   :  { %v86_v19 = vadd.s32 64, %v611_v1  ;;  %v87_v20 = vadd.s32 72, %v611_v1  ;;  %v84_v28 = vadd.s32 48, %v611_v1  ;;  %v85_v29 = vadd.s32 56, %v611_v1 }
  0x21   :  { %vm286_vm0 = vcmp.eq.s32.totalorder %v92_v4, %v630_v10  ;;  %vm288_vm1 = vcmp.eq.s32.totalorder %v93_v5, %v630_v10  ;;  %vm285_vm2 = vcmp.eq.s32.totalorder %v92_v4, %v627_v9  ;;  %vm287_vm3 = vcmp.eq.s32.totalorder %v93_v5, %v627_v9  ;;  %p560_p13 = por %p559_p12, %p558_p11 }
  0x22   :  { %vm471_vm4 = vmpackc.low %vm288_vm1, %vm286_vm0  ;;  %vm282_vm5 = vcmp.eq.s32.totalorder %v90_v7, %v630_v10  ;;  %vm284_vm6 = vcmp.eq.s32.totalorder %v91_v8, %v630_v10  ;;  %vm281_vm9 = vcmp.eq.s32.totalorder %v90_v7, %v627_v9  ;;  %vm283_vm10 = vcmp.eq.s32.totalorder %v91_v8, %v627_v9 }
  0x23   :  { %472 = vmatprep.subr.msk.bf16.mxu0 %vm471_vm4, %v581_v12  ;;  %vm473_vm7 = vmpackc.low %vm287_vm3, %vm285_vm2  ;;  %vm278_vm11 = vcmp.eq.s32.totalorder %v88_v13, %v630_v10  ;;  %vm280_vm12 = vcmp.eq.s32.totalorder %v89_v14, %v630_v10  ;;  %511 = vrsqrt.f32 %v117_v17  ;;  %v121_v21 = vmul.f32 %v120_v18, %v119_v16  ;;  %p561_p0 = pnand %p560_p13, %p554_p10 }
  0x24   :  { %474 = vmatpush1.bf16.xpose.msk.msra.mxu0 %vm473_vm7, %v581_v12  ;;  %vm475_vm8 = vmpackc.low %vm284_vm6, %vm282_vm5  ;;  %v126_v22 = vmul.f32 15.0, %v120_v18  ;;  %vm277_vm15 = vcmp.eq.s32.totalorder %v88_v13, %v627_v9  ;;  %vm279_vm0 = vcmp.eq.s32.totalorder %v89_v14, %v627_v9  ;;  %vm274_vm1 = vcmp.eq.s32.totalorder %v86_v19, %v630_v10 }
  0x25   :  { %476 = vmatprep.subr.msk.bf16.mxu0 %vm475_vm8, %v581_v12  ;;  %vm477_vm13 = vmpackc.low %vm283_vm10, %vm281_vm9  ;;  %v123_v23 = vmul.f32 6.0, %v121_v21  ;;  %vm276_vm2 = vcmp.eq.s32.totalorder %v87_v20, %v630_v10  ;;  %v129_v27 = vmul.f32 10.0, %v121_v21  ;;  %vm122_vm5 = vcmp.lt.f32.partialorder %v638_v11, 2.0 }
  0x26   :  { %vm479_vm14 = vmpackc.low %vm280_vm12, %vm278_vm11  ;;  %v127_v25 = vmul.f32 %v126_v22, %v120_v18  ;;  %vm273_vm6 = vcmp.eq.s32.totalorder %v86_v19, %v627_v9  ;;  %vm275_vm7 = vcmp.eq.s32.totalorder %v87_v20, %v627_v9  ;;  %vm270_vm8 = vcmp.eq.s32.totalorder %v84_v28, %v630_v10 }
  0x27   :  { %v124_v24 = vmul.f32 %v123_v23, %v120_v18  ;;  %vm481_vm3 = vmpackc.low %vm279_vm0, %vm277_vm15  ;;  %vm272_vm9 = vcmp.eq.s32.totalorder %v85_v29, %v630_v10  ;;  %v438_v39 = vadd.f32 -0.5, %v136_v32  ;;  %v82_v40 = vadd.s32 32, %v611_v1 }
  0x28   :  { %vm483_vm4 = vmpackc.low %vm276_vm2, %vm274_vm1  ;;  %v510_v33 = vpop.eup %509  ;;  %v83_v41 = vadd.s32 40, %v611_v1  ;;  %vm269_vm12 = vcmp.eq.s32.totalorder %v84_v28, %v627_v9  ;;  %vm140_vm0 = vcmp.le.f32.partialorder %v638_v11, 4.0  ;;  %v162_v49 = vunpack.c.0.s8 %v161_v46 }
  0x29   :  { %v125_v26 = vsub.f32 1.0, %v124_v24  ;;  %vm485_vm10 = vmpackc.low %vm275_vm7, %vm273_vm6  ;;  %v80_v50 = vadd.s32 16, %v611_v1  ;;  %v81_v51 = vadd.s32 24, %v611_v1  ;;  %v79_v60 = vadd.s32 8, %v611_v1 }
  0x2a   :  { %vm487_vm11 = vmpackc.low %vm272_vm9, %vm270_vm8  ;;  %vm268_vm15 = vcmp.eq.s32.totalorder %v83_v41, %v630_v10  ;;  %v165_v56 = vsub.s32 %v162_v49, %v611_v1 }
  0x2b   :  { %v128_v30 = vadd.f32 %v127_v25, %v125_v26  ;;  %vm264_vm6 = vcmp.eq.s32.totalorder %v81_v51, %v630_v10  ;;  %vm261_vm9 = vcmp.eq.s32.totalorder %v80_v50, %v627_v9 }
  0x2c   :  { %478 = vmatpush1.bf16.xpose.msk.msra.mxu0 %vm477_vm13, %v581_v12  ;;  %vm271_vm13 = vcmp.eq.s32.totalorder %v85_v29, %v627_v9 }
  0x2d   :  { %480 = vmatprep.subr.msk.bf16.mxu0 %vm479_vm14, %v581_v12  ;;  %v130_v31 = vsub.f32 %v128_v30, %v129_v27  ;;  %vm266_vm14 = vcmp.eq.s32.totalorder %v82_v40, %v630_v10  ;;  %vm489_vm1 = vmpackc.low %vm271_vm13, %vm269_vm12  ;;  %vm260_vm12 = vcmp.eq.s32.totalorder %v79_v60, %v630_v10 }
  0x2e   :  { %vm491_vm2 = vmpackc.low %vm268_vm15, %vm266_vm14  ;;  %vm257_vm15 = vcmp.eq.s32.totalorder %v611_v1, %v627_v9 }
  0x2f   :  { %v131_v34 = vsel %vm122_vm5, %v130_v31, 0.0  ;;  %vm262_vm5 = vcmp.eq.s32.totalorder %v80_v50, %v630_v10 }
  0x30   :  { %v512_v35 = vpop.eup %511  ;;  %v133_v36 = vsub.f32 1.0, %v131_v34  ;;  %vm495_vm8 = vmpackc.low %vm264_vm6, %vm262_vm5 }
  0x31   :  { %v132_v37 = vmul.f32 %v512_v35, %v131_v34 }
  0x32   :  { %v134_v38 = vmul.f32 %v510_v33, %v133_v36 }
  0x34   :  { %482 = vmatpush1.bf16.xpose.msk.msra.mxu0 %vm481_vm3, %v581_v12  ;;  %v135_v42 = vadd.f32 %v134_v38, %v132_v37  ;;  %vm265_vm3 = vcmp.eq.s32.totalorder %v82_v40, %v627_v9 }
  0x35   :  { %484 = vmatprep.subr.msk.bf16.mxu0 %vm483_vm4, %v581_v12  ;;  %vm267_vm4 = vcmp.eq.s32.totalorder %v83_v41, %v627_v9 }
  0x36   :  { %v138_v44 = vadd.f32 %v438_v39, %v135_v42  ;;  %vm493_vm7 = vmpackc.low %vm267_vm4, %vm265_vm3  ;;  %vm236_vm3 = vsmask.f32 256 }
  0x38   :  { %v139_v47 = vmul.f32 %v138_v44, %v112_v43 }
  0x3a   :  { %v141_v48 = vsel %vm140_vm0, %v139_v47, 0.0  ;;  %vm259_vm0 = vcmp.eq.s32.totalorder %v79_v60, %v627_v9 }
  0x3b   :  { %v146_v52 = vrot.slane %v141_v48, %v614_v2  ;;  %v150_v53 = vrot.slane %v141_v48, %v617_v3 }
  0x3c   :  { %486 = vmatpush1.bf16.xpose.msk.msra.mxu0 %vm485_vm10, %v581_v12  ;;  %vm263_vm10 = vcmp.eq.s32.totalorder %v81_v51, %v627_v9 }
  0x3d   :  { %488 = vmatprep.subr.msk.bf16.mxu0 %vm487_vm11, %v581_v12  ;;  %v153_v54 = vpack.c.bf16 %v146_v52, %v146_v52  ;;  %v154_v55 = vpack.c.bf16 %v150_v53, %v150_v53  ;;  %vm258_vm11 = vcmp.eq.s32.totalorder %v611_v1, %v630_v10  ;;  %vm497_vm13 = vmpackc.low %vm263_vm10, %vm261_vm9 }
  0x3e   :  { %vm499_vm14 = vmpackc.low %vm260_vm12, %vm258_vm11 }
  0x3f   :  { %v155_v57 = vunpack.c.l.bf16 %v153_v54  ;;  %v156_v58 = vunpack.c.l.bf16 %v154_v55 }
  0x41   :  { %v159_v59 = vcombine.low %v155_v57, %v156_v58 }
  0x43   :  { %v166_v61 = vrot.slane %v159_v59, %v165_v56 }
  0x44   :  { %490 = vmatpush1.bf16.xpose.msk.msra.mxu0 %vm489_vm1, %v581_v12  ;;  %vm501_vm1 = vmpackc.low %vm259_vm0, %vm257_vm15 }
  0x45   :  { %492 = vmatprep.subr.msk.bf16.mxu0 %vm491_vm2, %v581_v12  ;;  %v173_v62 = vrot.slane %v166_v61, %v165_v56  ;;  %vm235_vm2 = vcmask 1040384  }
  0x46   :  { %vm237_vm4 = vmand %vm235_vm2, %vm236_vm3 }
  0x47   :  { %v175_v63 = vsub.f32 %v141_v48, %v173_v62 }
  0x49   :  { %v180_v0 = vrot.slane %v175_v63, %v614_v2  ;;  %v184_v4 = vrot.slane %v175_v63, %v617_v3 }
  0x4b   :  { %v187_v5 = vpack.c.bf16 %v180_v0, %v180_v0  ;;  %v188_v6 = vpack.c.bf16 %v184_v4, %v184_v4 }
  0x4c   :  { %494 = vmatpush1.bf16.xpose.msk.msra.mxu0 %vm493_vm7, %v581_v12 }
  0x4d   :  { %496 = vmatprep.subr.msk.bf16.mxu0 %vm495_vm8, %v581_v12  ;;  %v189_v7 = vunpack.c.l.bf16 %v187_v5  ;;  %v190_v8 = vunpack.c.l.bf16 %v188_v6  ;;  %v227_v15 = vshll.u32 %v188_v6, 16  ;;  %v224_v16 = vshll.u32 %v187_v5, 16 }
  0x4f   :  { %v193_v10 = vcombine.low %v189_v7, %v190_v8  ;;  %v239_v20 = vsel %vm237_vm4, %v154_v55, %v227_v15  ;;  %v238_v9 = vsel %vm237_vm4, %v153_v54, %v224_v16 }
  0x51   :  { %v200_v11 = vrot.slane %v193_v10, %v165_v56 }
  0x53   :  { %v207_v13 = vrot.slane %v200_v11, %v165_v56 }
  0x54   :  { %498 = vmatpush1.bf16.xpose.msk.msra.mxu0 %vm497_vm13, %v581_v12 }
  0x55   :  { %500 = vmatprep.subr.msk.bf16.mxu0 %vm499_vm14, %v581_v12  ;;  %v209_v14 = vsub.f32 %v175_v63, %v207_v13 }
  0x57   :  { %v218_v17 = vrot.slane %v209_v14, %v617_v3  ;;  %v214_v18 = vrot.slane %v209_v14, %v614_v2 }
  0x59   :  { %v222_v19 = vpack.c.bf16 %v218_v17, %v218_v17  ;;  %v221_v1 = vpack.c.bf16 %v214_v18, %v214_v18 }
  0x5b   :  { %v234_v21 = vrot.slane %v222_v19, 7  ;;  %v233_v22 = vrot.slane %v221_v1, 7 }
  0x5c   :  { %502 = vmatpush1.bf16.xpose.msk.msra.mxu0 %vm501_vm1, %v581_v12  ;;  %v583_v12 = vmov 0.0  }
  0x5d   :  { %v247_v23 = vsel %vm235_vm2, %v239_v20, %v234_v21  ;;  %v243_v24 = vsel %vm235_vm2, %v238_v9, %v233_v22  ;;  %75 = vst [vmem:[#allocation7] sm:$0x1] %v583_v12 }
  0x5e   :  { %401 = vmatprep.mubr.bf16.mxu0 %v247_v23 }
  0x63   :  { %402 = vmatmul.mubr.bf16.vlgmr.msra.gmra.mxu0 %v243_v24 }
  0x64   :  { %v409_v30 = vld [vmem:[#allocation7] sm:$0x1] }
 0x123   :  { %v403_v25 = vpop.f32.mrf.mxu0 }
 0x124   :  { %v411_v26 = vrot.slane %v403_v25, 1  ;;  %v414_v3 = vrot.slane %v403_v25, 2 }
 0x125   :  { %v405_v27 = vpop.f32.mrf.mxu0 }
 0x126   :  { %v413_v28 = vadd.f32 %v411_v26, %v403_v25 }
 0x127   :  { %v406_v29 = vpop.f32.mrf.mxu0 }
 0x128   :  { %v416_v2 = vadd.f32 %v414_v3, %v413_v28 }
 0x129   :  { %v407_v31 = vpop.f32.mrf.mxu0 }
 0x12a   :  { %v417_v32 = vadd.f32 %v416_v2, %v409_v30 }
 0x12c   :  { %418 = vst [vmem:[#allocation7] sm:$0x1] %v417_v32 }
 0x12d   :  { %564 = shalt.err (!%p561_p0)
}
 0x12e   :  { %428 = dma.vmem_to_hbm [thread:$0]  %s426_s2, 16, %s715_s3, [#allocation4]  }
 0x12f   :  { %577 = dma.done.wait [#allocation4], 16  }
 0x130   :  { %578 = vsyncadd [#allocation4], 4294967280 }
 0x131   :  { %432 = vsyncpa [#allocation3], 1 }
 0x132   :  { %433 = vsyncpa [#allocation6], 1 }
 0x133   :  { %434 = vsyncpa [#allocation4], 1 }

</bundles_post_ra>
